<compile_context>
chip_gen: v7x
topology: tpu7x:2x2x1
jax: 0.10.0
libtpu: 0.0.40
codegen_flags: <defaults>
</compile_context>

<pallas_src>
import functools

import jax
import jax.numpy as jnp
from jax import lax
from jax.experimental import pallas as pl
from jax.experimental.pallas import tpu as pltpu


def _twinv_fused_kernel(x_ref, w1_ref, b1_ref, w2_ref, b2_ref, w3_ref, b3_ref,
                        out_ref):
    """One batch tile. Activations are (features, batch): batch on the lanes."""
    cdt = w1_ref.dtype
    x = x_ref[...].astype(cdt)                                   # (tb, D) cast in-kernel

    # Layer 1: (2H, D) . (tb, D) contracted over D  ->  (2H, tb), batch on lanes.
    h1 = lax.dot_general(w1_ref[...], x,
                         dimension_numbers=(((1,), (1,)), ((), ())),
                         preferred_element_type=jnp.float32)
    h1 = jnp.maximum(h1 + b1_ref[...], 0.0)                      # (2H, tb) f32

    # Layer 2: block-diagonal (2H, 2H) keeps the twins independent.
    h2 = jnp.dot(w2_ref[...], h1.astype(cdt),
                 preferred_element_type=jnp.float32)
    h2 = jnp.maximum(h2 + b2_ref[...], 0.0)                      # (2H, tb) f32

    # Layer 3 / heads: (2, 2H) @ (2H, tb) -> (2, tb); row 0 = v1, row 1 = v2.
    v = jnp.dot(w3_ref[...], h2.astype(cdt),
                preferred_element_type=jnp.float32)
    v1 = v[0:1, :] + b3_ref[0]                                   # SMEM scalar biases
    v2 = v[1:2, :] + b3_ref[1]

    # Elementwise min of the twins; lane-dense (1, tb) store.
    out_ref[...] = jnp.minimum(v1, v2).astype(out_ref.dtype)


def init_twinv_params(key, state_dim, hidden_dim=32, dtype=jnp.float32):
    """PyTorch-style (uniform +/- 1/sqrt(fan_in)) init; weights (in, out)."""
    def linear(k, fan_in, fan_out):
        kw, kb = jax.random.split(k)
        bound = 1.0 / jnp.sqrt(fan_in)
        w = jax.random.uniform(kw, (fan_in, fan_out), dtype, -bound, bound)
        b = jax.random.uniform(kb, (1, fan_out), dtype, -bound, bound)
        return w, b

    def one_net(k):
        k1, k2, k3 = jax.random.split(k, 3)
        w1, b1 = linear(k1, state_dim, hidden_dim)
        w2, b2 = linear(k2, hidden_dim, hidden_dim)
        w3, b3 = linear(k3, hidden_dim, 1)
        return dict(w1=w1, b1=b1, w2=w2, b2=b2, w3=w3.T, b3=b3)   # w3: (1, H)

    ka, kb = jax.random.split(key)
    return dict(v1=one_net(ka), v2=one_net(kb))


def pack_twinv_params(params, compute_dtype=jnp.bfloat16):
    """Fuse the twins into 7 packed arrays; weights (out, in) for batch-on-lanes."""
    p1, p2 = params["v1"], params["v2"]
    H = p1["w1"].shape[1]
    w1 = jnp.concatenate([p1["w1"].T, p2["w1"].T], axis=0)              # (2H, D)
    b1 = jnp.concatenate([p1["b1"], p2["b1"]], axis=1).T                # (2H, 1)
    w2 = jnp.zeros((2 * H, 2 * H), jnp.float32)
    w2 = w2.at[:H, :H].set(p1["w2"].T).at[H:, H:].set(p2["w2"].T)       # (2H, 2H)
    b2 = jnp.concatenate([p1["b2"], p2["b2"]], axis=1).T                # (2H, 1)
    w3 = jnp.zeros((2, 2 * H), jnp.float32)
    w3 = w3.at[0, :H].set(p1["w3"][0]).at[1, H:].set(p2["w3"][0])       # (2, 2H)
    b3 = jnp.stack([p1["b3"][0, 0], p2["b3"][0, 0]])                    # (2,)
    return dict(w1=w1.astype(compute_dtype), b1=b1.astype(jnp.float32),
                w2=w2.astype(compute_dtype), b2=b2.astype(jnp.float32),
                w3=w3.astype(compute_dtype), b3=b3.astype(jnp.float32))


def _choose_batch_tile(batch, max_tile=2048):
    """Tile = multiple of 128, <= max_tile; >=2 balanced steps for large batches
    (v7x has 2 TensorCores that shard the 'parallel' grid axis)."""
    padded = pl.cdiv(batch, 128) * 128
    if padded <= max_tile:
        if padded >= 1024 and padded % 256 == 0:
            return padded // 2          # two balanced tiles for megacore
        return padded
    num_tiles = pl.cdiv(padded, max_tile)
    return pl.cdiv(padded, num_tiles * 128) * 128


@functools.partial(jax.jit, static_argnames=("batch_tile",))
def twinv_forward(state, packed, batch_tile=None):
    """TwinV.forward: elementwise min of the two value MLPs. Returns (batch,) f32."""
    B, D = state.shape
    H2 = packed["w1"].shape[0]                      # 2 * hidden_dim
    if batch_tile is None:
        batch_tile = _choose_batch_tile(B)
    assert batch_tile % 128 == 0, "batch_tile must be a multiple of 128"

    num_tiles = pl.cdiv(B, batch_tile)
    padded_B = num_tiles * batch_tile
    x = state
    if padded_B != B:
        x = jnp.pad(x, ((0, padded_B - B), (0, 0)))   # only when B % tile != 0

    w_bytes = jnp.dtype(packed["w1"].dtype).itemsize
    n_weight = D * H2 + H2 * H2 + 2 * H2
    cost = pl.CostEstimate(
        flops=2 * padded_B * n_weight,
        transcendentals=0,
        bytes_accessed=(padded_B * D * jnp.dtype(state.dtype).itemsize
                        + n_weight * w_bytes + (2 * H2 + 2) * 4 + padded_B * 4))

    def fixed(shape):
        return pl.BlockSpec(shape, lambda i: (0, 0))

    out = pl.pallas_call(
        _twinv_fused_kernel,
        out_shape=jax.ShapeDtypeStruct((1, padded_B), jnp.float32),
        grid=(num_tiles,),
        in_specs=[
            pl.BlockSpec((batch_tile, D), lambda i: (i, 0)),          # state tile (f32)
            fixed((H2, D)), fixed((H2, 1)),                           # fused layer 1
            fixed((H2, H2)), fixed((H2, 1)),                          # fused layer 2
            fixed((2, H2)),                                           # fused heads
            pl.BlockSpec(memory_space=pltpu.MemorySpace.SMEM),        # head biases (2,)
        ],
        out_specs=pl.BlockSpec((1, batch_tile), lambda i: (0, i)),
        compiler_params=pltpu.CompilerParams(dimension_semantics=("parallel",)),
        cost_estimate=cost,
    )(x, packed["w1"], packed["b1"], packed["w2"], packed["b2"],
      packed["w3"], packed["b3"])
    return out[0, :B]


def twinv_reference(state, params):
    """Pure-JAX f32 reference of the PyTorch forward."""
    def one_net(p, x):
        h1 = jnp.maximum(x @ p["w1"] + p["b1"], 0.0)
        h2 = jnp.maximum(h1 @ p["w2"] + p["b2"], 0.0)
        return (h2 @ p["w3"].T + p["b3"])[:, 0]

    return jnp.minimum(one_net(params["v1"], state), one_net(params["v2"], state))


if __name__ == "__main__":
    key = jax.random.PRNGKey(0)
    k_param, k_state = jax.random.split(key)

    batch, state_dim, hidden_dim = 500, 16, 32   # batch not a multiple of 128 -> tests padding
    params = init_twinv_params(k_param, state_dim, hidden_dim)
    state = jax.random.normal(k_state, (batch, state_dim), jnp.float32)

    ref = twinv_reference(state, params)

    # Exact-precision f32 path (matches the PyTorch f32 module), auto-sized tile.
    packed_f32 = pack_twinv_params(params, compute_dtype=jnp.float32)
    out_f32 = jax.block_until_ready(twinv_forward(state, packed_f32))
    assert out_f32.shape == (batch,)
    assert jnp.allclose(out_f32, ref, atol=2e-5, rtol=2e-5), (out_f32, ref)

    # Multi-tile grid path (forces >=2 grid steps + tail padding).
    out_tiled = jax.block_until_ready(twinv_forward(state, packed_f32, batch_tile=256))
    assert jnp.allclose(out_tiled, ref, atol=2e-5, rtol=2e-5), (out_tiled, ref)

    # Bandwidth-optimized bf16 weight/activation path (f32 bias/ReLU/accum/min).
    packed_bf16 = pack_twinv_params(params, compute_dtype=jnp.bfloat16)
    out_bf16 = jax.block_until_ready(twinv_forward(state, packed_bf16))
    assert out_bf16.shape == (batch,)
    assert jnp.allclose(out_bf16, ref, atol=5e-2, rtol=5e-2), (out_bf16, ref)

    print("KERNEL_OK")
</pallas_src>

<mosaic_0001>
module attributes {stable_mosaic.version = 11 : i64} {
  func.func @_twinv_fused_kernel(%arg0: i32, %arg1: memref<512x16xf32, #tpu.memory_space<vmem>>, %arg2: memref<64x16xf32, #tpu.memory_space<vmem>>, %arg3: memref<64x1xf32, #tpu.memory_space<vmem>>, %arg4: memref<64x64xf32, #tpu.memory_space<vmem>>, %arg5: memref<64x1xf32, #tpu.memory_space<vmem>>, %arg6: memref<2x64xf32, #tpu.memory_space<vmem>>, %arg7: memref<2xf32, #tpu.memory_space<smem>>, %arg8: memref<1x512xf32, #tpu.memory_space<vmem>>) attributes {dimension_semantics = [#tpu.dimension_semantics<parallel>], iteration_bounds = array<i64: 1>, scalar_prefetch = 0 : i64, scratch_operands = 0 : i64, tpu.core_type = #tpu.core_type<tc>, window_params = [{transform_indices = @transform_0, window_bounds = array<i64: 512, 16>}, {pipeline_mode = #tpu.pipeline_mode<synchronous>, transform_indices = @transform_1, window_bounds = array<i64: 64, 16>}, {pipeline_mode = #tpu.pipeline_mode<synchronous>, transform_indices = @transform_2, window_bounds = array<i64: 64, 1>}, {pipeline_mode = #tpu.pipeline_mode<synchronous>, transform_indices = @transform_3, window_bounds = array<i64: 64, 64>}, {pipeline_mode = #tpu.pipeline_mode<synchronous>, transform_indices = @transform_4, window_bounds = array<i64: 64, 1>}, {pipeline_mode = #tpu.pipeline_mode<synchronous>, transform_indices = @transform_5, window_bounds = array<i64: 2, 64>}, {transform_indices = @transform_6, window_bounds = array<i64: 2>}, {transform_indices = @transform_7, window_bounds = array<i64: 1, 512>}]} {
    %c0 = arith.constant 0 : index
    %c0_0 = arith.constant 0 : index
    %0 = vector.load %arg1[%c0, %c0_0] : memref<512x16xf32, #tpu.memory_space<vmem>>, vector<512x16xf32>
    %c0_1 = arith.constant 0 : index
    %c0_2 = arith.constant 0 : index
    %1 = vector.load %arg2[%c0_1, %c0_2] : memref<64x16xf32, #tpu.memory_space<vmem>>, vector<64x16xf32>
    %cst = arith.constant dense<0.000000e+00> : vector<64x512xf32>
    %2 = tpu.matmul %1, %0, %cst {dimension_numbers = #tpu.dot_dimension_numbers<[1], [1], [0], [0], [0, 0, 1, 0], [], []>} : vector<64x16xf32>, vector<512x16xf32>, vector<64x512xf32> -> vector<64x512xf32>
    %c0_3 = arith.constant 0 : index
    %c0_4 = arith.constant 0 : index
    %3 = vector.load %arg3[%c0_3, %c0_4] : memref<64x1xf32, #tpu.memory_space<vmem>>, vector<64x1xf32>
    %4 = vector.broadcast %3 : vector<64x1xf32> to vector<64x512xf32>
    %5 = arith.addf %2, %4 : vector<64x512xf32>
    %cst_5 = arith.constant 0.000000e+00 : f32
    %6 = vector.broadcast %cst_5 : f32 to vector<64x512xf32>
    %7 = arith.maximumf %5, %6 : vector<64x512xf32>
    %c0_6 = arith.constant 0 : index
    %c0_7 = arith.constant 0 : index
    %8 = vector.load %arg4[%c0_6, %c0_7] : memref<64x64xf32, #tpu.memory_space<vmem>>, vector<64x64xf32>
    %cst_8 = arith.constant dense<0.000000e+00> : vector<64x512xf32>
    %9 = tpu.matmul %8, %7, %cst_8 {dimension_numbers = #tpu.dot_dimension_numbers<[1], [0], [0], [1], [0, 0, 1, 1], [], []>} : vector<64x64xf32>, vector<64x512xf32>, vector<64x512xf32> -> vector<64x512xf32>
    %c0_9 = arith.constant 0 : index
    %c0_10 = arith.constant 0 : index
    %10 = vector.load %arg5[%c0_9, %c0_10] : memref<64x1xf32, #tpu.memory_space<vmem>>, vector<64x1xf32>
    %11 = vector.broadcast %10 : vector<64x1xf32> to vector<64x512xf32>
    %12 = arith.addf %9, %11 : vector<64x512xf32>
    %cst_11 = arith.constant 0.000000e+00 : f32
    %13 = vector.broadcast %cst_11 : f32 to vector<64x512xf32>
    %14 = arith.maximumf %12, %13 : vector<64x512xf32>
    %c0_12 = arith.constant 0 : index
    %c0_13 = arith.constant 0 : index
    %15 = vector.load %arg6[%c0_12, %c0_13] : memref<2x64xf32, #tpu.memory_space<vmem>>, vector<2x64xf32>
    %cst_14 = arith.constant dense<0.000000e+00> : vector<2x512xf32>
    %16 = tpu.matmul %15, %14, %cst_14 {dimension_numbers = #tpu.dot_dimension_numbers<[1], [0], [0], [1], [0, 0, 1, 1], [], []>} : vector<2x64xf32>, vector<64x512xf32>, vector<2x512xf32> -> vector<2x512xf32>
    %17 = vector.extract_strided_slice %16 {offsets = [0, 0], sizes = [1, 512], strides = [1, 1]} : vector<2x512xf32> to vector<1x512xf32>
    %c0_15 = arith.constant 0 : index
    %18 = memref.load %arg7[%c0_15] : memref<2xf32, #tpu.memory_space<smem>>
    %19 = vector.broadcast %18 : f32 to vector<1x512xf32>
    %20 = arith.addf %17, %19 : vector<1x512xf32>
    %21 = vector.extract_strided_slice %16 {offsets = [1, 0], sizes = [1, 512], strides = [1, 1]} : vector<2x512xf32> to vector<1x512xf32>
    %c1 = arith.constant 1 : index
    %22 = memref.load %arg7[%c1] : memref<2xf32, #tpu.memory_space<smem>>
    %23 = vector.broadcast %22 : f32 to vector<1x512xf32>
    %24 = arith.addf %21, %23 : vector<1x512xf32>
    %25 = arith.minimumf %20, %24 : vector<1x512xf32>
    %c0_16 = arith.constant 0 : index
    %c0_17 = arith.constant 0 : index
    %26 = vector.load %arg8[%c0_16, %c0_17] : memref<1x512xf32, #tpu.memory_space<vmem>>, vector<1x512xf32>
    tpu.vector_store %arg8[%c0_16, %c0_17], %25 {strides = array<i32>} : memref<1x512xf32, #tpu.memory_space<vmem>>, vector<1x512xf32>,
    return
  }
  func.func @transform_0(%arg0: i32) -> (i32, i32) {
    %c0_i32 = arith.constant 0 : i32
    %c0_i32_0 = arith.constant 0 : i32
    return %arg0, %c0_i32 : i32, i32
  }
  func.func @transform_1(%arg0: i32) -> (i32, i32) {
    %c0_i32 = arith.constant 0 : i32
    %c0_i32_0 = arith.constant 0 : i32
    %c0_i32_1 = arith.constant 0 : i32
    return %c0_i32, %c0_i32_0 : i32, i32
  }
  func.func @transform_2(%arg0: i32) -> (i32, i32) {
    %c0_i32 = arith.constant 0 : i32
    %c0_i32_0 = arith.constant 0 : i32
    %c0_i32_1 = arith.constant 0 : i32
    return %c0_i32, %c0_i32_0 : i32, i32
  }
  func.func @transform_3(%arg0: i32) -> (i32, i32) {
    %c0_i32 = arith.constant 0 : i32
    %c0_i32_0 = arith.constant 0 : i32
    %c0_i32_1 = arith.constant 0 : i32
    return %c0_i32, %c0_i32_0 : i32, i32
  }
  func.func @transform_4(%arg0: i32) -> (i32, i32) {
    %c0_i32 = arith.constant 0 : i32
    %c0_i32_0 = arith.constant 0 : i32
    %c0_i32_1 = arith.constant 0 : i32
    return %c0_i32, %c0_i32_0 : i32, i32
  }
  func.func @transform_5(%arg0: i32) -> (i32, i32) {
    %c0_i32 = arith.constant 0 : i32
    %c0_i32_0 = arith.constant 0 : i32
    %c0_i32_1 = arith.constant 0 : i32
    return %c0_i32, %c0_i32_0 : i32, i32
  }
  func.func @transform_6(%arg0: i32) -> i32 {
    %c0_i32 = arith.constant 0 : i32
    %c0_i32_0 = arith.constant 0 : i32
    return %c0_i32 : i32
  }
  func.func @transform_7(%arg0: i32) -> (i32, i32) {
    %c0_i32 = arith.constant 0 : i32
    %c0_i32_0 = arith.constant 0 : i32
    return %c0_i32, %arg0 : i32, i32
  }
}

</mosaic_0001>

<bundles_post_ra>
// kernel: twinv_forward.1
= control target key start
LH: loop header
LB: loop body
LE: loop exit
PB: predicated region body
PF: predicated region fallthrough
CT: control target
= control target key end

     0   :  { %12 = vsyncpa [#allocation4], 0  ;;  %s2092_s0 = inlined_call_operand.vmem [shape: f32[512,16], index: 0, kind: input, shape index: {}]   ;;  %s2093_s1 = inlined_call_operand.vmem [shape: f32[64,16], index: 1, kind: input, shape index: {}]   ;;  %s2094_s2 = inlined_call_operand.vmem [shape: f32[64,1], index: 2, kind: input, shape index: {}]   ;;  %s2095_s3 = inlined_call_operand.vmem [shape: f32[64,64], index: 3, kind: input, shape index: {}]   ;;  %s2096_s4 = inlined_call_operand.vmem [shape: f32[64,1], index: 4, kind: input, shape index: {}]   ;;  %s2097_s5 = inlined_call_operand.vmem [shape: f32[2,64], index: 5, kind: input, shape index: {}]   ;;  %s2098_s6 = inlined_call_operand.vmem [shape: f32[2], index: 6, kind: input, shape index: {}]   ;;  %s2099_s7 = inlined_call_operand.hbm [shape: f32[1,512], index: 7, kind: output, shape index: {}]  }
   0x1   :  { %13 = vsyncpa [#allocation3], 0  ;;  %s32_s26 = sshll.u32 %s2098_s6, 4  ;;  %s33_s26 = int_to_ptr.vmem [resolvable:$true] %s32_s26 }
   0x2   :  { %s1559_s27 = scalar_lea.vmem %s33_s26, 16  ;;  %p1564_p1 = scmp.lt.s32.totalorder %s33_s26, %s33_s26 }
   0x3   :  { %p1560_p0 = scmp.ne.s32.totalorder %s33_s26, %s1559_s27  ;;  %p1565_p2 = scmp.lt.s32.totalorder %s1559_s27, %s1559_s27 }
   0x5   :  { %p1566_p3 = por %p1565_p2, %p1564_p1 }
   0x7   :  { %p1567_p4 = pnand %p1566_p3, %p1560_p0 }
   0x9   :  { %1570 = shalt.err (!%p1567_p4)
}
   0xa   :  { %s1597_s28 = smov [#allocation2]  }
   0xb   :  { %35 = dma.vmem_to_smem %s33_s26, 16, %s1597_s28, [#allocation4]  }
   0xc   :  { %1593 = dma.done.wait [#allocation4], 16  }
   0xd   :  { %1594 = vsyncadd [#allocation4], 4294967280 }
   0xe   :  { %39 = sfence }
   0xf   :  { %v56_v0 = vld [vmem:[%s2092_s0 + $0x80] sm:$0xff]  ;;  %v57_v1 = vld [vmem:[%s2092_s0 + $0x88] sm:$0xff]  ;;  %vm160_vm0 = vcmask 130048   ;;  %v1598_v7 = vmov 0   ;;  %v58_v14 = vld [vmem:[%s2092_s0 + $0x90] sm:$0xff]  ;;  %vm691_vm2 = vcmask 523264  }
  0x10   :  { %v88_v2 = vld [vmem:[%s2092_s0 + $0x180] sm:$0xff]  ;;  %v1392_v3 = vpack.c.bf16 %v57_v1, %v56_v0  ;;  %vm1656_vm1 = vmpackc.low %vm160_vm0, %vm160_vm0  ;;  %v89_v5 = vld [vmem:[%s2092_s0 + $0x188] sm:$0xff]  ;;  %1557 = vset.pattern.permute.xlu0 %v1598_v7  ;;  %1558 = vset.pattern.permute.xlu1 %v1598_v7  ;;  %s1295_s21 = sld [smem:[#allocation2 + $0x1]]  ;;  %s1120_s22 = sld [smem:[#allocation2]] }
  0x11   :  { %v40_v6 = vld [vmem:[%s2092_s0] sm:$0xff]  ;;  %v1440_v8 = vpack.c.bf16 %v89_v5, %v88_v2  ;;  %v41_v9 = vld [vmem:[%s2092_s0 + $0x8] sm:$0xff]  ;;  %v59_v15 = vld [vmem:[%s2092_s0 + $0x98] sm:$0xff] }
  0x12   :  { %v72_v10 = vld [vmem:[%s2092_s0 + $0x100] sm:$0xff]  ;;  %v73_v11 = vld [vmem:[%s2092_s0 + $0x108] sm:$0xff]  ;;  %1394 = vmatprep.subr.msk.bf16.mxu0 %vm1656_vm1, %v1392_v3  ;;  %v1395_v12 = vpack.c.bf16 %v41_v9, %v40_v6  ;;  %v90_v16 = vld [vmem:[%s2092_s0 + $0x190] sm:$0xff]  ;;  %v1398_v17 = vpack.c.bf16 %v59_v15, %v58_v14 }
  0x13   :  { %v1443_v13 = vpack.c.bf16 %v73_v11, %v72_v10  ;;  %1442 = vmatprep.subr.msk.bf16.mxu1 %vm1656_vm1, %v1440_v8  ;;  %v91_v18 = vld [vmem:[%s2092_s0 + $0x198] sm:$0xff]  ;;  %v42_v20 = vld [vmem:[%s2092_s0 + $0x10] sm:$0xff]  ;;  %v60_v24 = vld [vmem:[%s2092_s0 + $0xa0] sm:$0xff] }
  0x14   :  { %1397 = vmatpush3.bf16.xpose.msk.msra.mxu0 %vm1656_vm1, %v1395_v12  ;;  %v1446_v19 = vpack.c.bf16 %v91_v18, %v90_v16  ;;  %v43_v21 = vld [vmem:[%s2092_s0 + $0x18] sm:$0xff]  ;;  %v74_v22 = vld [vmem:[%s2092_s0 + $0x110] sm:$0xff]  ;;  %v61_v25 = vld [vmem:[%s2092_s0 + $0xa8] sm:$0xff] }
  0x15   :  { %1445 = vmatpush3.bf16.xpose.msk.msra.mxu1 %vm1656_vm1, %v1443_v13  ;;  %1400 = vmatprep.subr.msk.bf16.mxu0 %vm1656_vm1, %v1398_v17  ;;  %v75_v23 = vld [vmem:[%s2092_s0 + $0x118] sm:$0xff]  ;;  %v92_v26 = vld [vmem:[%s2092_s0 + $0x1a0] sm:$0xff]  ;;  %v93_v27 = vld [vmem:[%s2092_s0 + $0x1a8] sm:$0xff]  ;;  %v1401_v28 = vpack.c.bf16 %v43_v21, %v42_v20  ;;  %v1404_v30 = vpack.c.bf16 %v61_v25, %v60_v24 }
  0x16   :  { %1448 = vmatprep.subr.msk.bf16.mxu1 %vm1656_vm1, %v1446_v19  ;;  %v1449_v29 = vpack.c.bf16 %v75_v23, %v74_v22  ;;  %v1452_v31 = vpack.c.bf16 %v93_v27, %v92_v26  ;;  %v44_v32 = vld [vmem:[%s2092_s0 + $0x20] sm:$0xff]  ;;  %v45_v33 = vld [vmem:[%s2092_s0 + $0x28] sm:$0xff]  ;;  %v62_v36 = vld [vmem:[%s2092_s0 + $0xb0] sm:$0xff] }
  0x17   :  { %v76_v34 = vld [vmem:[%s2092_s0 + $0x120] sm:$0xff]  ;;  %v77_v35 = vld [vmem:[%s2092_s0 + $0x128] sm:$0xff]  ;;  %v63_v37 = vld [vmem:[%s2092_s0 + $0xb8] sm:$0xff]  ;;  %v1407_v40 = vpack.c.bf16 %v45_v33, %v44_v32 }
  0x18   :  { %v94_v38 = vld [vmem:[%s2092_s0 + $0x1b0] sm:$0xff]  ;;  %v95_v39 = vld [vmem:[%s2092_s0 + $0x1b8] sm:$0xff]  ;;  %v1455_v41 = vpack.c.bf16 %v77_v35, %v76_v34  ;;  %v1410_v42 = vpack.c.bf16 %v63_v37, %v62_v36  ;;  %v1768_v46 = vld [vmem:[%s2093_s1] sm:$0xff] }
  0x19   :  { %v1458_v43 = vpack.c.bf16 %v95_v39, %v94_v38  ;;  %v46_v44 = vld [vmem:[%s2092_s0 + $0x30] sm:$0xff]  ;;  %v47_v45 = vld [vmem:[%s2092_s0 + $0x38] sm:$0xff]  ;;  %v64_v49 = vld [vmem:[%s2092_s0 + $0xc0] sm:$0xff]  ;;  %1328 = vmatprep.mubr.msk.f32.mxu0 %vm160_vm0, %v1768_v46  ;;  %1376 = vmatprep.mubr.msk.f32.mxu1 %vm160_vm0, %v1768_v46 }
  0x1a   :  { %v78_v47 = vld [vmem:[%s2092_s0 + $0x130] sm:$0xff]  ;;  %v79_v48 = vld [vmem:[%s2092_s0 + $0x138] sm:$0xff]  ;;  %v65_v50 = vld [vmem:[%s2092_s0 + $0xc8] sm:$0xff]  ;;  %v1413_v54 = vpack.c.bf16 %v47_v45, %v46_v44 }
  0x1b   :  { %v96_v51 = vld [vmem:[%s2092_s0 + $0x1c0] sm:$0xff]  ;;  %v97_v52 = vld [vmem:[%s2092_s0 + $0x1c8] sm:$0xff]  ;;  %v1461_v55 = vpack.c.bf16 %v79_v48, %v78_v47  ;;  %v114_v56 = vld [vmem:[%s2094_s2 + $0x10] sm:$0xff]  ;;  %v1416_v57 = vpack.c.bf16 %v65_v50, %v64_v49 }
  0x1c   :  { %1403 = vmatpush3.bf16.xpose.msk.msra.mxu0 %vm1656_vm1, %v1401_v28  ;;  %v112_v53 = vld [vmem:[%s2094_s2] sm:$0xff]  ;;  %v1464_v58 = vpack.c.bf16 %v97_v52, %v96_v51  ;;  %132 = vperm.xlu1 %1558, %v114_v56   ;;  %v113_v59 = vld [vmem:[%s2094_s2 + $0x8] sm:$0xff]  ;;  %v115_v60 = vld [vmem:[%s2094_s2 + $0x18] sm:$0xff] }
  0x1d   :  { %1451 = vmatpush3.bf16.xpose.msk.msra.mxu1 %vm1656_vm1, %v1449_v29  ;;  %1406 = vmatprep.subr.msk.bf16.mxu0 %vm1656_vm1, %v1404_v30  ;;  %v48_v61 = vld [vmem:[%s2092_s0 + $0x40] sm:$0xff]  ;;  %v49_v62 = vld [vmem:[%s2092_s0 + $0x48] sm:$0xff]  ;;  %v66_v1 = vld [vmem:[%s2092_s0 + $0xd0] sm:$0xff] }
  0x1e   :  { %1454 = vmatprep.subr.msk.bf16.mxu1 %vm1656_vm1, %v1452_v31  ;;  %122 = vperm.xlu0 %1557, %v112_v53   ;;  %v80_v63 = vld [vmem:[%s2092_s0 + $0x140] sm:$0xff]  ;;  %v81_v0 = vld [vmem:[%s2092_s0 + $0x148] sm:$0xff]  ;;  %v67_v2 = vld [vmem:[%s2092_s0 + $0xd8] sm:$0xff]  ;;  %v1419_v8 = vpack.c.bf16 %v49_v62, %v48_v61 }
  0x1f   :  { %v98_v3 = vld [vmem:[%s2092_s0 + $0x1d0] sm:$0xff]  ;;  %v99_v5 = vld [vmem:[%s2092_s0 + $0x1d8] sm:$0xff]  ;;  %v116_v6 = vld [vmem:[%s2094_s2 + $0x20] sm:$0xff]  ;;  %v1467_v9 = vpack.c.bf16 %v81_v0, %v80_v63  ;;  %v1422_v10 = vpack.c.bf16 %v67_v2, %v66_v1 }
  0x20   :  { %137 = vperm.xlu1 %1558, %v115_v60   ;;  %v117_v7 = vld [vmem:[%s2094_s2 + $0x28] sm:$0xff]  ;;  %v1470_v11 = vpack.c.bf16 %v99_v5, %v98_v3  ;;  %v118_v12 = vld [vmem:[%s2094_s2 + $0x30] sm:$0xff]  ;;  %v119_v13 = vld [vmem:[%s2094_s2 + $0x38] sm:$0xff] }
  0x21   :  { %v50_v14 = vld [vmem:[%s2092_s0 + $0x50] sm:$0xff]  ;;  %v51_v15 = vld [vmem:[%s2092_s0 + $0x58] sm:$0xff]  ;;  %v68_v18 = vld [vmem:[%s2092_s0 + $0xe0] sm:$0xff] }
  0x22   :  { %127 = vperm.xlu0 %1557, %v113_v59   ;;  %v82_v16 = vld [vmem:[%s2092_s0 + $0x150] sm:$0xff]  ;;  %v83_v17 = vld [vmem:[%s2092_s0 + $0x158] sm:$0xff]  ;;  %v69_v19 = vld [vmem:[%s2092_s0 + $0xe8] sm:$0xff]  ;;  %v1425_v24 = vpack.c.bf16 %v51_v15, %v50_v14 }
  0x23   :  { %v100_v20 = vld [vmem:[%s2092_s0 + $0x1e0] sm:$0xff]  ;;  %v101_v21 = vld [vmem:[%s2092_s0 + $0x1e8] sm:$0xff]  ;;  %v1473_v25 = vpack.c.bf16 %v83_v17, %v82_v16  ;;  %v1428_v26 = vpack.c.bf16 %v69_v19, %v68_v18  ;;  %v645_v28 = vld [vmem:[%s2096_s4 + $0x10] sm:$0xff] }
  0x24   :  { %1409 = vmatpush3.bf16.xpose.msk.msra.mxu0 %vm1656_vm1, %v1407_v40  ;;  %147 = vperm.xlu1 %1558, %v117_v7   ;;  %v643_v22 = vld [vmem:[%s2096_s4] sm:$0xff]  ;;  %v644_v23 = vld [vmem:[%s2096_s4 + $0x8] sm:$0xff]  ;;  %v1476_v27 = vpack.c.bf16 %v101_v21, %v100_v20  ;;  %v646_v29 = vld [vmem:[%s2096_s4 + $0x18] sm:$0xff] }
  0x25   :  { %1457 = vmatpush3.bf16.xpose.msk.msra.mxu1 %vm1656_vm1, %v1455_v41  ;;  %1412 = vmatprep.subr.msk.bf16.mxu0 %vm1656_vm1, %v1410_v42  ;;  %v52_v30 = vld [vmem:[%s2092_s0 + $0x60] sm:$0xff]  ;;  %v53_v31 = vld [vmem:[%s2092_s0 + $0x68] sm:$0xff]  ;;  %v70_v34 = vld [vmem:[%s2092_s0 + $0xf0] sm:$0xff] }
  0x26   :  { %1460 = vmatprep.subr.msk.bf16.mxu1 %vm1656_vm1, %v1458_v43  ;;  %142 = vperm.xlu0 %1557, %v116_v6   ;;  %v84_v32 = vld [vmem:[%s2092_s0 + $0x160] sm:$0xff]  ;;  %v85_v33 = vld [vmem:[%s2092_s0 + $0x168] sm:$0xff]  ;;  %v71_v35 = vld [vmem:[%s2092_s0 + $0xf8] sm:$0xff]  ;;  %v1431_v40 = vpack.c.bf16 %v53_v31, %v52_v30 }
  0x27   :  { %v102_v36 = vld [vmem:[%s2092_s0 + $0x1f0] sm:$0xff]  ;;  %v103_v37 = vld [vmem:[%s2092_s0 + $0x1f8] sm:$0xff]  ;;  %v647_v38 = vld [vmem:[%s2096_s4 + $0x20] sm:$0xff]  ;;  %v1479_v41 = vpack.c.bf16 %v85_v33, %v84_v32  ;;  %v1434_v42 = vpack.c.bf16 %v71_v35, %v70_v34 }
  0x28   :  { %157 = vperm.xlu1 %1558, %v119_v13   ;;  %v648_v39 = vld [vmem:[%s2096_s4 + $0x28] sm:$0xff]  ;;  %v1482_v43 = vpack.c.bf16 %v103_v37, %v102_v36  ;;  %v649_v44 = vld [vmem:[%s2096_s4 + $0x30] sm:$0xff]  ;;  %v650_v45 = vld [vmem:[%s2096_s4 + $0x38] sm:$0xff] }
  0x29   :  { %v54_v47 = vld [vmem:[%s2092_s0 + $0x70] sm:$0xff]  ;;  %v55_v48 = vld [vmem:[%s2092_s0 + $0x78] sm:$0xff]  ;;  %v105_v53 = vld [vmem:[%s2093_s1 + $0x8] sm:$0xff] }
  0x2a   :  { %152 = vperm.xlu0 %1557, %v118_v12   ;;  %v86_v49 = vld [vmem:[%s2092_s0 + $0x170] sm:$0xff]  ;;  %v87_v50 = vld [vmem:[%s2092_s0 + $0x178] sm:$0xff]  ;;  %v1437_v51 = vpack.c.bf16 %v55_v48, %v54_v47 }
  0x2b   :  { %v1485_v52 = vpack.c.bf16 %v87_v50, %v86_v49  ;;  %v107_v4 = vld [vmem:[%s2093_s1 + $0x18] sm:$0xff]  ;;  %v110_v56 = vld [vmem:[%s2093_s1 + $0x30] sm:$0xff] }
  0x2c   :  { %1415 = vmatpush3.bf16.xpose.msk.msra.mxu0 %vm1656_vm1, %v1413_v54  ;;  %658 = vperm.xlu1 %1558, %v644_v23   ;;  %v106_v54 = vld [vmem:[%s2093_s1 + $0x10] sm:$0xff] }
  0x2d   :  { %1463 = vmatpush3.bf16.xpose.msk.msra.mxu1 %vm1656_vm1, %v1461_v55  ;;  %1418 = vmatprep.subr.msk.bf16.mxu0 %vm1656_vm1, %v1416_v57  ;;  %v109_v55 = vld [vmem:[%s2093_s1 + $0x28] sm:$0xff]  ;;  %v111_v57 = vld [vmem:[%s2093_s1 + $0x38] sm:$0xff] }
  0x2e   :  { %1466 = vmatprep.subr.msk.bf16.mxu1 %vm1656_vm1, %v1464_v58  ;;  %653 = vperm.xlu0 %1557, %v643_v22   ;;  %v1599_v58 = vmov 0.0  }
  0x30   :  { %668 = vperm.xlu1 %1558, %v646_v29  }
  0x32   :  { %663 = vperm.xlu0 %1557, %v645_v28  }
  0x34   :  { %1421 = vmatpush3.bf16.xpose.msk.msra.mxu0 %vm1656_vm1, %v1419_v8  ;;  %678 = vperm.xlu1 %1558, %v648_v39  }
  0x35   :  { %1469 = vmatpush3.bf16.xpose.msk.msra.mxu1 %vm1656_vm1, %v1467_v9  ;;  %1424 = vmatprep.subr.msk.bf16.mxu0 %vm1656_vm1, %v1422_v10 }
  0x36   :  { %1472 = vmatprep.subr.msk.bf16.mxu1 %vm1656_vm1, %v1470_v11  ;;  %673 = vperm.xlu0 %1557, %v647_v38  }
  0x38   :  { %688 = vperm.xlu1 %1558, %v650_v45  }
  0x3a   :  { %683 = vperm.xlu0 %1557, %v649_v44  }
  0x3c   :  { %1427 = vmatpush3.bf16.xpose.msk.msra.mxu0 %vm1656_vm1, %v1425_v24 }
  0x3d   :  { %1475 = vmatpush3.bf16.xpose.msk.msra.mxu1 %vm1656_vm1, %v1473_v25  ;;  %1430 = vmatprep.subr.msk.bf16.mxu0 %vm1656_vm1, %v1428_v26 }
  0x3e   :  { %1478 = vmatprep.subr.msk.bf16.mxu1 %vm1656_vm1, %v1476_v27 }
  0x44   :  { %1433 = vmatpush3.bf16.xpose.msk.msra.mxu0 %vm1656_vm1, %v1431_v40 }
  0x45   :  { %1481 = vmatpush3.bf16.xpose.msk.msra.mxu1 %vm1656_vm1, %v1479_v41  ;;  %1436 = vmatprep.subr.msk.bf16.mxu0 %vm1656_vm1, %v1434_v42 }
  0x46   :  { %1484 = vmatprep.subr.msk.bf16.mxu1 %vm1656_vm1, %v1482_v43 }
  0x4c   :  { %1439 = vmatpush3.bf16.xpose.msk.msra.mxu0 %vm1656_vm1, %v1437_v51 }
  0x4d   :  { %1487 = vmatpush3.bf16.xpose.msk.msra.mxu1 %vm1656_vm1, %v1485_v52 }
  0x53   :  { %1329 = vmatmul.mubr.msk.f32.vlgmr.msra.gmra.mrb[0].mxu0 %vm160_vm0, %v1768_v46 }
  0x54   :  { %1377 = vmatmul.mubr.msk.f32.vlgmr.msra.gmra.mrb[0].mxu1 %vm160_vm0, %v1768_v46  ;;  %1330 = vmatprep.mubr.msk.f32.mxu0 %vm160_vm0, %v105_v53  ;;  %v108_v46 = vld [vmem:[%s2093_s1 + $0x20] sm:$0xff] }
  0x55   :  { %1378 = vmatprep.mubr.msk.f32.mxu1 %vm160_vm0, %v105_v53 }
  0x57   :  { %1331 = vmatmul.mubr.msk.f32.gmra.mrb[2].mxu0 %vm160_vm0, %v105_v53 }
  0x58   :  { %1379 = vmatmul.mubr.msk.f32.gmra.mrb[2].mxu1 %vm160_vm0, %v105_v53  ;;  %1332 = vmatprep.mubr.msk.f32.mxu0 %vm160_vm0, %v106_v54 }
  0x59   :  { %1380 = vmatprep.mubr.msk.f32.mxu1 %vm160_vm0, %v106_v54 }
  0x5b   :  { %1333 = vmatmul.mubr.msk.f32.gmra.mrb[4].mxu0 %vm160_vm0, %v106_v54 }
  0x5c   :  { %1381 = vmatmul.mubr.msk.f32.gmra.mrb[4].mxu1 %vm160_vm0, %v106_v54  ;;  %1334 = vmatprep.mubr.msk.f32.mxu0 %vm160_vm0, %v107_v4 }
  0x5d   :  { %1382 = vmatprep.mubr.msk.f32.mxu1 %vm160_vm0, %v107_v4 }
  0x5f   :  { %1335 = vmatmul.mubr.msk.f32.gmra.mrb[6].mxu0 %vm160_vm0, %v107_v4 }
  0x60   :  { %1383 = vmatmul.mubr.msk.f32.gmra.mrb[6].mxu1 %vm160_vm0, %v107_v4  ;;  %1336 = vmatprep.mubr.msk.f32.mxu0 %vm160_vm0, %v108_v46 }
  0x61   :  { %1384 = vmatprep.mubr.msk.f32.mxu1 %vm160_vm0, %v108_v46 }
  0x63   :  { %1337 = vmatmul.mubr.msk.f32.gmra.mrb[8].mxu0 %vm160_vm0, %v108_v46 }
  0x64   :  { %1385 = vmatmul.mubr.msk.f32.gmra.mrb[8].mxu1 %vm160_vm0, %v108_v46  ;;  %1338 = vmatprep.mubr.msk.f32.mxu0 %vm160_vm0, %v109_v55 }
  0x65   :  { %1386 = vmatprep.mubr.msk.f32.mxu1 %vm160_vm0, %v109_v55 }
  0x67   :  { %1339 = vmatmul.mubr.msk.f32.gmra.mrb[10].mxu0 %vm160_vm0, %v109_v55 }
  0x68   :  { %1387 = vmatmul.mubr.msk.f32.gmra.mrb[10].mxu1 %vm160_vm0, %v109_v55  ;;  %1340 = vmatprep.mubr.msk.f32.mxu0 %vm160_vm0, %v110_v56 }
  0x69   :  { %1388 = vmatprep.mubr.msk.f32.mxu1 %vm160_vm0, %v110_v56 }
  0x6b   :  { %1341 = vmatmul.mubr.msk.f32.gmra.mrb[12].mxu0 %vm160_vm0, %v110_v56 }
  0x6c   :  { %1389 = vmatmul.mubr.msk.f32.gmra.mrb[12].mxu1 %vm160_vm0, %v110_v56  ;;  %1342 = vmatprep.mubr.msk.f32.mxu0 %vm160_vm0, %v111_v57 }
  0x6d   :  { %1390 = vmatprep.mubr.msk.f32.mxu1 %vm160_vm0, %v111_v57 }
  0x6f   :  { %1343 = vmatmul.mubr.msk.f32.gmra.mrb[14].mxu0 %vm160_vm0, %v111_v57 }
  0x70   :  { %1391 = vmatmul.mubr.msk.f32.gmra.mrb[14].mxu1 %vm160_vm0, %v111_v57  ;;  %780 = vmatprep.mubr.f32.mxu0 %v1599_v58 }
  0x71   :  { %893 = vmatprep.mubr.f32.mxu1 %v1599_v58 }
  0x9b   :  { %v133_v1 = vpop.permute.xlu1 %132 }
  0x9d   :  { %v123_v59 = vpop.permute.xlu0 %122 }
  0x9f   :  { %v138_v31 = vpop.permute.xlu1 %137 }
  0xa1   :  { %v128_v0 = vpop.permute.xlu0 %127 }
  0xa5   :  { %v143_v57 = vpop.permute.xlu0 %142 }
 0x126   :  { %v443_v60 = vpop.f32.mrb[0].mxu0 }
 0x127   :  { %v556_v61 = vpop.f32.mrb[0].mxu1  ;;  %v445_v62 = vpop.f32.mrb[1].mxu0  ;;  %v444_v2 = vadd.f32 %v443_v60, %v123_v59 }
 0x128   :  { %v558_v63 = vpop.f32.mrb[1].mxu1  ;;  %v557_v3 = vadd.f32 %v556_v61, %v123_v59  ;;  %v446_v5 = vadd.f32 %v445_v62, %v123_v59  ;;  %v148_v61 = vpop.permute.xlu1 %147 }
 0x129   :  { %v559_v6 = vadd.f32 %v558_v63, %v123_v59  ;;  %v603_v15 = vmax.f32 %v444_v2, 0.0 }
 0x12a   :  { %v449_v7 = vpop.f32.mrb[2].mxu0  ;;  %v605_v16 = vmax.f32 %v557_v3, 0.0  ;;  %v604_v19 = vmax.f32 %v446_v5, 0.0 }
 0x12b   :  { %v562_v8 = vpop.f32.mrb[2].mxu1  ;;  %v450_v9 = vadd.f32 %v449_v7, %v128_v0  ;;  %v451_v11 = vpop.f32.mrb[3].mxu0  ;;  %v606_v20 = vmax.f32 %v559_v6, 0.0 }
 0x12c   :  { %v563_v10 = vadd.f32 %v562_v8, %v128_v0  ;;  %v564_v12 = vpop.f32.mrb[3].mxu1  ;;  %v452_v13 = vadd.f32 %v451_v11, %v128_v0 }
 0x12d   :  { %v565_v14 = vadd.f32 %v564_v12, %v128_v0  ;;  %v607_v17 = vmax.f32 %v450_v9, 0.0 }
 0x12e   :  { %v609_v18 = vmax.f32 %v563_v10, 0.0  ;;  %v608_v21 = vmax.f32 %v452_v13, 0.0  ;;  %v455_v23 = vpop.f32.mrb[4].mxu0 }
 0x12f   :  { %v610_v22 = vmax.f32 %v565_v14, 0.0  ;;  %v568_v24 = vpop.f32.mrb[4].mxu1  ;;  %v1490_v25 = vpack.c.bf16 %v607_v17, %v603_v15  ;;  %v457_v27 = vpop.f32.mrb[5].mxu0  ;;  %v456_v32 = vadd.f32 %v455_v23, %v133_v1 }
 0x130   :  { %v1506_v26 = vpack.c.bf16 %v609_v18, %v605_v16  ;;  %v570_v28 = vpop.f32.mrb[5].mxu1  ;;  %v1488_v29 = vpack.c.bf16 %v608_v21, %v604_v19  ;;  %v569_v33 = vadd.f32 %v568_v24, %v133_v1  ;;  %v458_v34 = vadd.f32 %v457_v27, %v133_v1 }
 0x131   :  { %v1504_v30 = vpack.c.bf16 %v610_v22, %v606_v20  ;;  %v571_v35 = vadd.f32 %v570_v28, %v133_v1  ;;  %v611_v44 = vmax.f32 %v456_v32, 0.0  ;;  %v158_v28 = vpop.permute.xlu1 %157 }
 0x132   :  { %v461_v36 = vpop.f32.mrb[6].mxu0  ;;  %1489 = vmatprep.subr.bf16.mxu0 %v1488_v29  ;;  %v613_v45 = vmax.f32 %v569_v33, 0.0  ;;  %v612_v49 = vmax.f32 %v458_v34, 0.0 }
 0x133   :  { %v574_v37 = vpop.f32.mrb[6].mxu1  ;;  %1505 = vmatprep.subr.bf16.mxu1 %v1504_v30  ;;  %v462_v38 = vadd.f32 %v461_v36, %v138_v31  ;;  %v463_v40 = vpop.f32.mrb[7].mxu0  ;;  %1491 = vmatpush1.bf16.msra.mxu0 %v1490_v25  ;;  %v614_v50 = vmax.f32 %v571_v35, 0.0 }
 0x134   :  { %v575_v39 = vadd.f32 %v574_v37, %v138_v31  ;;  %v576_v41 = vpop.f32.mrb[7].mxu1  ;;  %1507 = vmatpush1.bf16.msra.mxu1 %v1506_v26  ;;  %v464_v42 = vadd.f32 %v463_v40, %v138_v31  ;;  %v153_v25 = vpop.permute.xlu0 %152 }
 0x135   :  { %v577_v43 = vadd.f32 %v576_v41, %v138_v31  ;;  %v615_v47 = vmax.f32 %v462_v38, 0.0 }
 0x136   :  { %v617_v48 = vmax.f32 %v575_v39, 0.0  ;;  %v616_v51 = vmax.f32 %v464_v42, 0.0  ;;  %v467_v53 = vpop.f32.mrb[8].mxu0 }
 0x137   :  { %v618_v52 = vmax.f32 %v577_v43, 0.0  ;;  %v580_v54 = vpop.f32.mrb[8].mxu1  ;;  %v1494_v4 = vpack.c.bf16 %v615_v47, %v611_v44  ;;  %v469_v55 = vpop.f32.mrb[9].mxu0  ;;  %v468_v62 = vadd.f32 %v467_v53, %v143_v57 }
 0x138   :  { %v1510_v46 = vpack.c.bf16 %v617_v48, %v613_v45  ;;  %v582_v56 = vpop.f32.mrb[9].mxu1  ;;  %v1492_v59 = vpack.c.bf16 %v616_v51, %v612_v49  ;;  %v581_v63 = vadd.f32 %v580_v54, %v143_v57  ;;  %v470_v0 = vadd.f32 %v469_v55, %v143_v57  ;;  %v635_v54 = vld [vmem:[%s2095_s3] sm:$0xff]  ;;  %v638_v55 = vld [vmem:[%s2095_s3 + $0x18] sm:$0xff] }
 0x139   :  { %v1508_v60 = vpack.c.bf16 %v618_v52, %v614_v50  ;;  %v583_v1 = vadd.f32 %v582_v56, %v143_v57  ;;  %v619_v11 = vmax.f32 %v468_v62, 0.0  ;;  %v639_v56 = vld [vmem:[%s2095_s3 + $0x20] sm:$0xff]  ;;  %v640_v57 = vld [vmem:[%s2095_s3 + $0x28] sm:$0xff] }
 0x13a   :  { %v473_v2 = vpop.f32.mrb[10].mxu0  ;;  %1493 = vmatprep.subr.bf16.mxu0 %v1492_v59  ;;  %v621_v12 = vmax.f32 %v581_v63, 0.0  ;;  %v620_v15 = vmax.f32 %v470_v0, 0.0  ;;  %v641_v59 = vld [vmem:[%s2095_s3 + $0x30] sm:$0xff] }
 0x13b   :  { %v586_v3 = vpop.f32.mrb[10].mxu1  ;;  %1509 = vmatprep.subr.bf16.mxu1 %v1508_v60  ;;  %v474_v5 = vadd.f32 %v473_v2, %v148_v61  ;;  %v475_v7 = vpop.f32.mrb[11].mxu0  ;;  %1495 = vmatpush1.bf16.msra.mxu0 %v1494_v4  ;;  %v622_v16 = vmax.f32 %v583_v1, 0.0  ;;  %v636_v4 = vld [vmem:[%s2095_s3 + $0x8] sm:$0xff]  ;;  %v642_v60 = vld [vmem:[%s2095_s3 + $0x38] sm:$0xff] }
 0x13c   :  { %v587_v6 = vadd.f32 %v586_v3, %v148_v61  ;;  %v588_v8 = vpop.f32.mrb[11].mxu1  ;;  %1511 = vmatpush1.bf16.msra.mxu1 %v1510_v46  ;;  %v476_v9 = vadd.f32 %v475_v7, %v148_v61  ;;  %v637_v46 = vld [vmem:[%s2095_s3 + $0x10] sm:$0xff]  ;;  %v654_v1 = vpop.permute.xlu0 %653 }
 0x13d   :  { %v589_v10 = vadd.f32 %v588_v8, %v148_v61  ;;  %v623_v13 = vmax.f32 %v474_v5, 0.0  ;;  %v659_v2 = vpop.permute.xlu1 %658 }
 0x13e   :  { %v625_v14 = vmax.f32 %v587_v6, 0.0  ;;  %v624_v17 = vmax.f32 %v476_v9, 0.0  ;;  %v479_v19 = vpop.f32.mrb[12].mxu0 }
 0x13f   :  { %v626_v18 = vmax.f32 %v589_v10, 0.0  ;;  %v592_v20 = vpop.f32.mrb[12].mxu1  ;;  %v1498_v21 = vpack.c.bf16 %v623_v13, %v619_v11  ;;  %v481_v23 = vpop.f32.mrb[13].mxu0  ;;  %v480_v29 = vadd.f32 %v479_v19, %v153_v25 }
 0x140   :  { %v1514_v22 = vpack.c.bf16 %v625_v14, %v621_v12  ;;  %v594_v24 = vpop.f32.mrb[13].mxu1  ;;  %v1496_v26 = vpack.c.bf16 %v624_v17, %v620_v15  ;;  %v593_v30 = vadd.f32 %v592_v20, %v153_v25  ;;  %v482_v31 = vadd.f32 %v481_v23, %v153_v25 }
 0x141   :  { %v1512_v27 = vpack.c.bf16 %v626_v18, %v622_v16  ;;  %v595_v32 = vadd.f32 %v594_v24, %v153_v25  ;;  %v627_v41 = vmax.f32 %v480_v29, 0.0  ;;  %v664_v29 = vpop.permute.xlu0 %663 }
 0x142   :  { %v485_v33 = vpop.f32.mrb[14].mxu0  ;;  %1497 = vmatprep.subr.bf16.mxu0 %v1496_v26  ;;  %v629_v42 = vmax.f32 %v593_v30, 0.0  ;;  %v628_v45 = vmax.f32 %v482_v31, 0.0 }
 0x143   :  { %v598_v34 = vpop.f32.mrb[14].mxu1  ;;  %1513 = vmatprep.subr.bf16.mxu1 %v1512_v27  ;;  %v486_v35 = vadd.f32 %v485_v33, %v158_v28  ;;  %v487_v37 = vpop.f32.mrb[15].mxu0  ;;  %1499 = vmatpush1.bf16.msra.mxu0 %v1498_v21  ;;  %v630_v47 = vmax.f32 %v595_v32, 0.0 }
 0x144   :  { %v599_v36 = vadd.f32 %v598_v34, %v158_v28  ;;  %v600_v38 = vpop.f32.mrb[15].mxu1  ;;  %1515 = vmatpush1.bf16.msra.mxu1 %v1514_v22  ;;  %v488_v39 = vadd.f32 %v487_v37, %v158_v28  ;;  %v669_v32 = vpop.permute.xlu1 %668 }
 0x145   :  { %v601_v40 = vadd.f32 %v600_v38, %v158_v28  ;;  %v631_v43 = vmax.f32 %v486_v35, 0.0 }
 0x146   :  { %v633_v44 = vmax.f32 %v599_v36, 0.0  ;;  %v632_v48 = vmax.f32 %v488_v39, 0.0 }
 0x147   :  { %v634_v49 = vmax.f32 %v601_v40, 0.0  ;;  %v1502_v50 = vpack.c.bf16 %v631_v43, %v627_v41 }
 0x148   :  { %v1518_v51 = vpack.c.bf16 %v633_v44, %v629_v42  ;;  %v1500_v52 = vpack.c.bf16 %v632_v48, %v628_v45 }
 0x149   :  { %v1516_v53 = vpack.c.bf16 %v634_v49, %v630_v47 }
 0x14a   :  { %1501 = vmatprep.subr.bf16.mxu0 %v1500_v52 }
 0x14b   :  { %1517 = vmatprep.subr.bf16.mxu1 %v1516_v53  ;;  %1503 = vmatpush1.bf16.msra.mxu0 %v1502_v50 }
 0x14c   :  { %1519 = vmatpush1.bf16.msra.mxu1 %v1518_v51 }
 0x14e   :  { %1277 = vmatmul.mubr.msk.f32.vlgmr.msra.gmra.mrb[16].mxu0 %vm691_vm2, %v635_v54 }
 0x14f   :  { %1285 = vmatmul.mubr.msk.f32.vlgmr.msra.gmra.mrb[16].mxu1 %vm691_vm2, %v635_v54  ;;  %786 = vmatprep.mubr.f32.mxu0 %v1599_v58 }
 0x150   :  { %899 = vmatprep.mubr.f32.mxu1 %v1599_v58 }
 0x152   :  { %1278 = vmatmul.mubr.msk.f32.gmra.mrb[18].mxu0 %vm691_vm2, %v636_v4 }
 0x153   :  { %1286 = vmatmul.mubr.msk.f32.gmra.mrb[18].mxu1 %vm691_vm2, %v636_v4  ;;  %792 = vmatprep.mubr.f32.mxu0 %v1599_v58 }
 0x154   :  { %905 = vmatprep.mubr.f32.mxu1 %v1599_v58 }
 0x156   :  { %1279 = vmatmul.mubr.msk.f32.gmra.mrb[20].mxu0 %vm691_vm2, %v637_v46 }
 0x157   :  { %1287 = vmatmul.mubr.msk.f32.gmra.mrb[20].mxu1 %vm691_vm2, %v637_v46  ;;  %798 = vmatprep.mubr.f32.mxu0 %v1599_v58 }
 0x158   :  { %911 = vmatprep.mubr.f32.mxu1 %v1599_v58 }
 0x15a   :  { %1280 = vmatmul.mubr.msk.f32.gmra.mrb[22].mxu0 %vm691_vm2, %v638_v55 }
 0x15b   :  { %1288 = vmatmul.mubr.msk.f32.gmra.mrb[22].mxu1 %vm691_vm2, %v638_v55  ;;  %804 = vmatprep.mubr.f32.mxu0 %v1599_v58 }
 0x15c   :  { %917 = vmatprep.mubr.f32.mxu1 %v1599_v58 }
 0x15e   :  { %1281 = vmatmul.mubr.msk.f32.gmra.mrb[24].mxu0 %vm691_vm2, %v639_v56 }
 0x15f   :  { %1289 = vmatmul.mubr.msk.f32.gmra.mrb[24].mxu1 %vm691_vm2, %v639_v56  ;;  %810 = vmatprep.mubr.f32.mxu0 %v1599_v58 }
 0x160   :  { %923 = vmatprep.mubr.f32.mxu1 %v1599_v58 }
 0x162   :  { %1282 = vmatmul.mubr.msk.f32.gmra.mrb[26].mxu0 %vm691_vm2, %v640_v57 }
 0x163   :  { %1290 = vmatmul.mubr.msk.f32.gmra.mrb[26].mxu1 %vm691_vm2, %v640_v57  ;;  %816 = vmatprep.mubr.f32.mxu0 %v1599_v58 }
 0x164   :  { %929 = vmatprep.mubr.f32.mxu1 %v1599_v58 }
 0x166   :  { %1283 = vmatmul.mubr.msk.f32.gmra.mrb[28].mxu0 %vm691_vm2, %v641_v59 }
 0x167   :  { %1291 = vmatmul.mubr.msk.f32.gmra.mrb[28].mxu1 %vm691_vm2, %v641_v59  ;;  %822 = vmatprep.mubr.f32.mxu0 %v1599_v58  ;;  %v674_v59 = vpop.permute.xlu0 %673 }
 0x168   :  { %935 = vmatprep.mubr.f32.mxu1 %v1599_v58 }
 0x16a   :  { %1284 = vmatmul.mubr.msk.f32.gmra.mrb[30].mxu0 %vm691_vm2, %v642_v60 }
 0x16b   :  { %1292 = vmatmul.mubr.msk.f32.gmra.mrb[30].mxu1 %vm691_vm2, %v642_v60  ;;  %1042 = vmatprep.mubr.f32.mxu0 %v1599_v58 }
 0x16c   :  { %1113 = vmatprep.mubr.f32.mxu1 %v1599_v58 }
 0x221   :  { %v782_v61 = vpop.f32.mrb[16].mxu0 }
 0x222   :  { %v895_v62 = vpop.f32.mrb[16].mxu1  ;;  %v784_v63 = vpop.f32.mrb[17].mxu0  ;;  %v783_v3 = vadd.f32 %v782_v61, %v654_v1 }
 0x223   :  { %v897_v0 = vpop.f32.mrb[17].mxu1  ;;  %v896_v5 = vadd.f32 %v895_v62, %v654_v1  ;;  %v785_v6 = vadd.f32 %v784_v63, %v654_v1  ;;  %v679_v62 = vpop.permute.xlu1 %678 }
 0x224   :  { %v898_v7 = vadd.f32 %v897_v0, %v654_v1  ;;  %v942_v16 = vmax.f32 %v783_v3, 0.0 }
 0x225   :  { %v788_v8 = vpop.f32.mrb[18].mxu0  ;;  %v944_v58 = vmax.f32 %v896_v5, 0.0  ;;  %v943_v19 = vmax.f32 %v785_v6, 0.0 }
 0x226   :  { %v901_v9 = vpop.f32.mrb[18].mxu1  ;;  %v789_v10 = vadd.f32 %v788_v8, %v659_v2  ;;  %v790_v12 = vpop.f32.mrb[19].mxu0  ;;  %v945_v20 = vmax.f32 %v898_v7, 0.0 }
 0x227   :  { %v902_v11 = vadd.f32 %v901_v9, %v659_v2  ;;  %v903_v13 = vpop.f32.mrb[19].mxu1  ;;  %v791_v14 = vadd.f32 %v790_v12, %v659_v2 }
 0x228   :  { %v904_v15 = vadd.f32 %v903_v13, %v659_v2  ;;  %v946_v17 = vmax.f32 %v789_v10, 0.0 }
 0x229   :  { %v948_v18 = vmax.f32 %v902_v11, 0.0  ;;  %v947_v21 = vmax.f32 %v791_v14, 0.0  ;;  %v794_v23 = vpop.f32.mrb[20].mxu0 }
 0x22a   :  { %v949_v22 = vmax.f32 %v904_v15, 0.0  ;;  %v907_v24 = vpop.f32.mrb[20].mxu1  ;;  %v1522_v25 = vpack.c.bf16 %v946_v17, %v942_v16  ;;  %v796_v27 = vpop.f32.mrb[21].mxu0  ;;  %v795_v33 = vadd.f32 %v794_v23, %v664_v29 }
 0x22b   :  { %v1538_v26 = vpack.c.bf16 %v948_v18, %v944_v58  ;;  %v909_v28 = vpop.f32.mrb[21].mxu1  ;;  %v1520_v30 = vpack.c.bf16 %v947_v21, %v943_v19  ;;  %v908_v34 = vadd.f32 %v907_v24, %v664_v29  ;;  %v797_v35 = vadd.f32 %v796_v27, %v664_v29 }
 0x22c   :  { %v1536_v31 = vpack.c.bf16 %v949_v22, %v945_v20  ;;  %v910_v36 = vadd.f32 %v909_v28, %v664_v29  ;;  %v950_v45 = vmax.f32 %v795_v33, 0.0  ;;  %v689_v28 = vpop.permute.xlu1 %688 }
 0x22d   :  { %v800_v37 = vpop.f32.mrb[22].mxu0  ;;  %1521 = vmatprep.subr.bf16.mxu0 %v1520_v30  ;;  %v952_v47 = vmax.f32 %v908_v34, 0.0  ;;  %v951_v50 = vmax.f32 %v797_v35, 0.0 }
 0x22e   :  { %v913_v38 = vpop.f32.mrb[22].mxu1  ;;  %1537 = vmatprep.subr.bf16.mxu1 %v1536_v31  ;;  %v801_v39 = vadd.f32 %v800_v37, %v669_v32  ;;  %v802_v41 = vpop.f32.mrb[23].mxu0  ;;  %1523 = vmatpush1.bf16.msra.mxu0 %v1522_v25  ;;  %v953_v51 = vmax.f32 %v910_v36, 0.0 }
 0x22f   :  { %v914_v40 = vadd.f32 %v913_v38, %v669_v32  ;;  %v915_v42 = vpop.f32.mrb[23].mxu1  ;;  %1539 = vmatpush1.bf16.msra.mxu1 %v1538_v26  ;;  %v803_v43 = vadd.f32 %v802_v41, %v669_v32  ;;  %v684_v25 = vpop.permute.xlu0 %683 }
 0x230   :  { %v916_v44 = vadd.f32 %v915_v42, %v669_v32  ;;  %v954_v48 = vmax.f32 %v801_v39, 0.0 }
 0x231   :  { %v956_v49 = vmax.f32 %v914_v40, 0.0  ;;  %v955_v52 = vmax.f32 %v803_v43, 0.0  ;;  %v806_v54 = vpop.f32.mrb[24].mxu0 }
 0x232   :  { %v957_v53 = vmax.f32 %v916_v44, 0.0  ;;  %v919_v4 = vpop.f32.mrb[24].mxu1  ;;  %v1526_v46 = vpack.c.bf16 %v954_v48, %v950_v45  ;;  %v808_v56 = vpop.f32.mrb[25].mxu0  ;;  %v807_v63 = vadd.f32 %v806_v54, %v674_v59  ;;  %v974_v54 = vld [vmem:[%s2097_s5] sm:$0x3]  ;;  %s1601_s5 = smov [#allocation5]  }
 0x233   :  { %v1542_v55 = vpack.c.bf16 %v956_v49, %v952_v47  ;;  %v921_v57 = vpop.f32.mrb[25].mxu1  ;;  %v1524_v60 = vpack.c.bf16 %v955_v52, %v951_v50  ;;  %v920_v0 = vadd.f32 %v919_v4, %v674_v59  ;;  %v809_v1 = vadd.f32 %v808_v56, %v674_v59  ;;  %s1188_s23 = sshll.u32 %s1601_s5, 4  ;;  %s1189_s23 = int_to_ptr.vmem [resolvable:$true] %s1188_s23 }
 0x234   :  { %v1540_v61 = vpack.c.bf16 %v957_v53, %v953_v51  ;;  %v922_v2 = vadd.f32 %v921_v57, %v674_v59  ;;  %v958_v12 = vmax.f32 %v807_v63, 0.0  ;;  %v1127_v4 = vstv %s1295_s21  ;;  %s1571_s24 = scalar_lea.vmem %s1189_s23, 64  ;;  %p1576_p6 = scmp.lt.s32.totalorder %s1189_s23, %s1189_s23 }
 0x235   :  { %v812_v3 = vpop.f32.mrb[26].mxu0  ;;  %1525 = vmatprep.subr.bf16.mxu0 %v1524_v60  ;;  %v960_v13 = vmax.f32 %v920_v0, 0.0  ;;  %v959_v16 = vmax.f32 %v809_v1, 0.0  ;;  %v1157_v56 = vlaneseq  ;;  %v1121_v59 = vstv %s1120_s22  ;;  %p1572_p5 = scmp.ne.s32.totalorder %s1189_s23, %s1571_s24  ;;  %p1577_p7 = scmp.lt.s32.totalorder %s1571_s24, %s1571_s24 }
 0x236   :  { %v925_v5 = vpop.f32.mrb[26].mxu1  ;;  %1541 = vmatprep.subr.bf16.mxu1 %v1540_v61  ;;  %v813_v6 = vadd.f32 %v812_v3, %v679_v62  ;;  %v814_v8 = vpop.f32.mrb[27].mxu0  ;;  %1527 = vmatpush1.bf16.msra.mxu0 %v1526_v46  ;;  %v961_v58 = vmax.f32 %v922_v2, 0.0  ;;  %v1600_v46 = vmov 1966171168  }
 0x237   :  { %v926_v7 = vadd.f32 %v925_v5, %v679_v62  ;;  %v927_v9 = vpop.f32.mrb[27].mxu1  ;;  %1543 = vmatpush1.bf16.msra.mxu1 %v1542_v55  ;;  %v815_v10 = vadd.f32 %v814_v8, %v679_v62  ;;  %v1155_v55 = vunpack.c.l.s4 %v1600_v46  ;;  %v1158_v5 = vshrl.u32 %v1157_v56, 7  ;;  %p1578_p8 = por %p1577_p7, %p1576_p6 }
 0x238   :  { %v928_v11 = vadd.f32 %v927_v9, %v679_v62  ;;  %v962_v14 = vmax.f32 %v813_v6, 0.0  ;;  %vm1179_vm3 = vcmp.lt.s32.totalorder %v1157_v56, 512 }
 0x239   :  { %v964_v15 = vmax.f32 %v926_v7, 0.0  ;;  %v963_v17 = vmax.f32 %v815_v10, 0.0  ;;  %v818_v19 = vpop.f32.mrb[28].mxu0  ;;  %v1156_v3 = vunpack.c.0.s8 %v1155_v55  ;;  %p1579_p9 = pnand %p1578_p8, %p1572_p5 }
 0x23a   :  { %v965_v18 = vmax.f32 %v928_v11, 0.0  ;;  %v931_v20 = vpop.f32.mrb[28].mxu1  ;;  %v1530_v21 = vpack.c.bf16 %v962_v14, %v958_v12  ;;  %v820_v23 = vpop.f32.mrb[29].mxu0  ;;  %v819_v29 = vadd.f32 %v818_v19, %v684_v25 }
 0x23b   :  { %v1546_v22 = vpack.c.bf16 %v964_v15, %v960_v13  ;;  %v933_v24 = vpop.f32.mrb[29].mxu1  ;;  %v1528_v26 = vpack.c.bf16 %v963_v17, %v959_v16  ;;  %v932_v30 = vadd.f32 %v931_v20, %v684_v25  ;;  %v821_v31 = vadd.f32 %v820_v23, %v684_v25 }
 0x23c   :  { %v1544_v27 = vpack.c.bf16 %v965_v18, %v961_v58  ;;  %v934_v32 = vadd.f32 %v933_v24, %v684_v25  ;;  %v966_v41 = vmax.f32 %v819_v29, 0.0  ;;  %v1159_v17 = vsub.s32 %v1156_v3, %v1158_v5 }
 0x23d   :  { %v824_v33 = vpop.f32.mrb[30].mxu0  ;;  %1529 = vmatprep.subr.bf16.mxu0 %v1528_v26  ;;  %v968_v42 = vmax.f32 %v932_v30, 0.0  ;;  %v967_v45 = vmax.f32 %v821_v31, 0.0 }
 0x23e   :  { %v937_v34 = vpop.f32.mrb[30].mxu1  ;;  %1545 = vmatprep.subr.bf16.mxu1 %v1544_v27  ;;  %v825_v35 = vadd.f32 %v824_v33, %v689_v28  ;;  %v826_v37 = vpop.f32.mrb[31].mxu0  ;;  %1531 = vmatpush1.bf16.msra.mxu0 %v1530_v21  ;;  %v969_v47 = vmax.f32 %v934_v32, 0.0 }
 0x23f   :  { %v938_v36 = vadd.f32 %v937_v34, %v689_v28  ;;  %v939_v38 = vpop.f32.mrb[31].mxu1  ;;  %1547 = vmatpush1.bf16.msra.mxu1 %v1546_v22  ;;  %v827_v39 = vadd.f32 %v826_v37, %v689_v28 }
 0x240   :  { %v940_v40 = vadd.f32 %v939_v38, %v689_v28  ;;  %v970_v43 = vmax.f32 %v825_v35, 0.0 }
 0x241   :  { %v972_v44 = vmax.f32 %v938_v36, 0.0  ;;  %v971_v48 = vmax.f32 %v827_v39, 0.0 }
 0x242   :  { %v973_v49 = vmax.f32 %v940_v40, 0.0  ;;  %v1534_v50 = vpack.c.bf16 %v970_v43, %v966_v41 }
 0x243   :  { %v1550_v51 = vpack.c.bf16 %v972_v44, %v968_v42  ;;  %v1532_v52 = vpack.c.bf16 %v971_v48, %v967_v45 }
 0x244   :  { %v1548_v53 = vpack.c.bf16 %v973_v49, %v969_v47 }
 0x245   :  { %1533 = vmatprep.subr.bf16.mxu0 %v1532_v52 }
 0x246   :  { %1549 = vmatprep.subr.bf16.mxu1 %v1548_v53  ;;  %1535 = vmatpush1.bf16.msra.mxu0 %v1534_v50 }
 0x247   :  { %1551 = vmatpush1.bf16.msra.mxu1 %v1550_v51 }
 0x249   :  { %1293 = vmatmul.mubr.msk.f32.vlgmr.msra.gmra.mrb[32].mxu0 %vm691_vm2, %v974_v54 }
 0x24a   :  { %1294 = vmatmul.mubr.msk.f32.vlgmr.msra.gmra.mrb[32].mxu1 %vm691_vm2, %v974_v54 }
 0x31c   :  { %v1044_v57 = vpop.f32.mrb[32].mxu0 }
 0x31d   :  { %v1115_v60 = vpop.f32.mrb[32].mxu1  ;;  %v1128_v61 = vadd.f32 %v1127_v4, %v1044_v57  ;;  %v1046_v63 = vpop.f32.mrb[33].mxu0  ;;  %v1122_v6 = vadd.f32 %v1121_v59, %v1044_v57 }
 0x31e   :  { %v1130_v62 = vadd.f32 %v1127_v4, %v1115_v60  ;;  %v1117_v0 = vpop.f32.mrb[33].mxu1  ;;  %v1129_v1 = vadd.f32 %v1127_v4, %v1046_v63  ;;  %v1124_v8 = vadd.f32 %v1121_v59, %v1115_v60  ;;  %v1123_v10 = vadd.f32 %v1121_v59, %v1046_v63 }
 0x31f   :  { %v1131_v2 = vadd.f32 %v1127_v4, %v1117_v0  ;;  %v1136_v7 = vrot.slane %v1128_v61, 1  ;;  %v1125_v12 = vadd.f32 %v1121_v59, %v1117_v0 }
 0x320   :  { %v1138_v9 = vrot.slane %v1130_v62, 1  ;;  %v1137_v11 = vrot.slane %v1129_v1, 1 }
 0x321   :  { %v1139_v13 = vrot.slane %v1131_v2, 1  ;;  %v1144_v14 = vmin.f32 %v1122_v6, %v1136_v7 }
 0x322   :  { %v1146_v15 = vmin.f32 %v1124_v8, %v1138_v9  ;;  %v1145_v16 = vmin.f32 %v1123_v10, %v1137_v11 }
 0x323   :  { %v1147_v58 = vmin.f32 %v1125_v12, %v1139_v13 }
 0x324   :  { %v1152_v18 = vcombine.low %v1144_v14, %v1145_v16 }
 0x325   :  { %v1153_v19 = vcombine.low %v1146_v15, %v1147_v58 }
 0x326   :  { %v1160_v20 = vrot.slane %v1152_v18, %v1159_v17 }
 0x327   :  { %v1167_v21 = vrot.slane %v1153_v19, %v1159_v17 }
 0x329   :  { %v1168_v22 = vcombine.low %v1160_v20, %v1167_v21 }
 0x32b   :  { %v1175_v23 = vrot.slane %v1168_v22, %v1159_v17 }
 0x32d   :  { %1181 = vst.msk [vmem:[#allocation5] sm:$0xf] %vm1179_vm3, %v1175_v23 }
 0x32e   :  { %1582 = shalt.err (!%p1579_p9)
}
 0x32f   :  { %s1583_s27 = scalar_lea.hbm %s2099_s7, 64 }
 0x330   :  { %p1584_p10 = scmp.ne.s32.totalorder %s2099_s7, %s1583_s27  ;;  %p1587_p11 = scmp.lt.u32.totalorder %s1583_s27, %s2099_s7 }
 0x332   :  { %p1589_p12 = pnand %p1587_p11, %p1584_p10 }
 0x334   :  { %1592 = shalt.err (!%p1589_p12)
}
 0x335   :  { %1191 = dma.vmem_to_hbm [thread:$0]  %s1189_s23, 64, %s2099_s7, [#allocation3]  }
 0x336   :  { %1595 = dma.done.wait [#allocation3], 64  }
 0x337   :  { %1596 = vsyncadd [#allocation3], 4294967232 }
 0x338   :  { %1195 = vsyncpa [#allocation3], 1 }
 0x339   :  { %1196 = vsyncpa [#allocation4], 1 }

</bundles_post_ra>
